<compile_context>
chip_gen: v6e
topology: v6e:2x2x1
jax: 0.10.0
libtpu: 0.0.40
codegen_flags: <defaults>
</compile_context>

<pallas_src>
import jax
import jax.numpy as jnp
import numpy as np
from jax.experimental import pallas as pl
from jax.experimental.pallas import tpu as pltpu

Z_DIM = 64
HIDDEN = 256
OUT_POINTS = 64                      # M (number of decoded 3-D points); small synthetic choice
OUT_FEATS = OUT_POINTS * 3           # 192 (== full last dim of the output -> no lane padding)


def _round_up(x, m):
    return ((x + m - 1) // m) * m


def point_decoder_kernel(z_ref, w1_ref, b1_ref, w2_ref, b2_ref, w3_ref, b3_ref, out_ref):
    # z tile: (B_TILE, 64) f32.  All three matmuls run bf16 x bf16 with f32 MXU
    # accumulation (single-pass MXU path); bias add + ReLU stay in f32.
    z = z_ref[...].astype(jnp.bfloat16)
    h1 = jnp.dot(z, w1_ref[...], preferred_element_type=jnp.float32) + b1_ref[...]
    h1 = jnp.maximum(h1, 0.0).astype(jnp.bfloat16)
    h2 = jnp.dot(h1, w2_ref[...], preferred_element_type=jnp.float32) + b2_ref[...]
    h2 = jnp.maximum(h2, 0.0).astype(jnp.bfloat16)
    out_ref[...] = jnp.dot(h2, w3_ref[...], preferred_element_type=jnp.float32) + b3_ref[...]


def decode_points(z_batch, params, *, b_tile=512):
    """Batched decode: z_batch (B, Z_DIM) f32 -> (B, OUT_POINTS, 3) f32."""
    w1, b1, w2, b2, w3, b3 = params
    B = z_batch.shape[0]

    bt = min(b_tile, _round_up(B, 8))            # at least one full sublane group of rows
    if B >= 16:
        # keep >= 2 grid steps so the parallel batch axis can split across v7x's 2 TCs
        bt = min(bt, _round_up(-(-B // 2), 8))
    bt = _round_up(bt, 8)
    Bp = _round_up(B, bt)
    if Bp != B:
        z_batch = jnp.pad(z_batch, ((0, Bp - B), (0, 0)))

    flat = pl.pallas_call(
        point_decoder_kernel,
        out_shape=jax.ShapeDtypeStruct((Bp, OUT_FEATS), jnp.float32),
        grid=(Bp // bt,),
        in_specs=[
            pl.BlockSpec((bt, Z_DIM), lambda i: (i, 0)),          # z: tiled along batch
            pl.BlockSpec((Z_DIM, HIDDEN), lambda i: (0, 0)),      # w1: resident across grid
            pl.BlockSpec((1, HIDDEN), lambda i: (0, 0)),          # b1
            pl.BlockSpec((HIDDEN, HIDDEN), lambda i: (0, 0)),     # w2
            pl.BlockSpec((1, HIDDEN), lambda i: (0, 0)),          # b2
            pl.BlockSpec((HIDDEN, OUT_FEATS), lambda i: (0, 0)),  # w3 (192 wide, no padding)
            pl.BlockSpec((1, OUT_FEATS), lambda i: (0, 0)),       # b3
        ],
        out_specs=pl.BlockSpec((bt, OUT_FEATS), lambda i: (i, 0)),
        compiler_params=pltpu.CompilerParams(
            dimension_semantics=("parallel",),        # megacore-shard the batch grid on v7x
            vmem_limit_bytes=32 * 1024 * 1024,        # safe on v7x's 64 MiB VMEM
        ),
    )(z_batch, w1, b1, w2, b2, w3, b3)

    if Bp != B:
        flat = flat[:B]
    # contiguous reshape (B, 192) -> (B, M, 3): no extra HBM pass
    return flat.reshape(B, OUT_POINTS, 3)


def point_decoder(z, params):
    """Module-semantics forward: z (1, Z_DIM) f32 -> (OUT_POINTS, 3) f32."""
    # TODO(synk): for a single latent the Pallas call is pure launch overhead; batch
    # requests through decode_points (or fall back to plain XLA) in production.
    return decode_points(z, params, b_tile=8)[0]


def init_params(key):
    """Deterministic init mimicking nn.Linear default: U(-1/sqrt(fan_in), 1/sqrt(fan_in)).
    Weights are stored transposed relative to PyTorch, i.e. (in_features, out_features),
    quantized to bf16; biases stay f32."""
    def linear(k, fan_in, fan_out):
        kw, kb = jax.random.split(k)
        bound = 1.0 / np.sqrt(fan_in)
        w = jax.random.uniform(kw, (fan_in, fan_out), jnp.float32, -bound, bound)
        b = jax.random.uniform(kb, (1, fan_out), jnp.float32, -bound, bound)
        return w.astype(jnp.bfloat16), b

    k1, k2, k3 = jax.random.split(key, 3)
    w1, b1 = linear(k1, Z_DIM, HIDDEN)
    w2, b2 = linear(k2, HIDDEN, HIDDEN)
    w3, b3 = linear(k3, HIDDEN, OUT_FEATS)
    return w1, b1, w2, b2, w3, b3


def reference(z_batch, params):
    """Pure-JAX reference of the same forward pass (same bf16-quantized weights,
    f32 activations)."""
    w1, b1, w2, b2, w3, b3 = params
    h1 = jnp.maximum(z_batch @ w1.astype(jnp.float32) + b1, 0.0)
    h2 = jnp.maximum(h1 @ w2.astype(jnp.float32) + b2, 0.0)
    out = h2 @ w3.astype(jnp.float32) + b3
    return out.reshape(z_batch.shape[0], OUT_POINTS, 3)


if __name__ == "__main__":
    root = jax.random.PRNGKey(0)
    kz, kb, kp = jax.random.split(root, 3)
    params = init_params(kp)

    # --- module-semantics path: single latent (1, 64) -> (M, 3) ---
    z = jax.random.normal(kz, (1, Z_DIM), jnp.float32)
    pts = jax.block_until_ready(point_decoder(z, params))
    assert pts.shape == (OUT_POINTS, 3), pts.shape
    np.testing.assert_allclose(
        np.asarray(pts), np.asarray(reference(z, params)[0]), rtol=3e-2, atol=3e-2)

    # --- batched path: (B, 64) -> (B, M, 3); default b_tile=512 -> 2 grid steps ---
    B = 1024
    zb = jax.random.normal(kb, (B, Z_DIM), jnp.float32)
    out_b = jax.block_until_ready(decode_points(zb, params))
    assert out_b.shape == (B, OUT_POINTS, 3), out_b.shape
    np.testing.assert_allclose(
        np.asarray(out_b), np.asarray(reference(zb, params)), rtol=3e-2, atol=3e-2)

    print("KERNEL_OK")
</pallas_src>

<mosaic_0001>
module attributes {stable_mosaic.version = 11 : i64} {
  func.func @point_decoder_kernel(%arg0: i32, %arg1: memref<8x64xf32, #tpu.memory_space<vmem>>, %arg2: memref<64x256xbf16, #tpu.memory_space<vmem>>, %arg3: memref<1x256xf32, #tpu.memory_space<vmem>>, %arg4: memref<256x256xbf16, #tpu.memory_space<vmem>>, %arg5: memref<1x256xf32, #tpu.memory_space<vmem>>, %arg6: memref<256x192xbf16, #tpu.memory_space<vmem>>, %arg7: memref<1x192xf32, #tpu.memory_space<vmem>>, %arg8: memref<8x192xf32, #tpu.memory_space<vmem>>) attributes {dimension_semantics = [#tpu.dimension_semantics<parallel>], iteration_bounds = array<i64: 1>, scalar_prefetch = 0 : i64, scratch_operands = 0 : i64, tpu.core_type = #tpu.core_type<tc>, window_params = [{transform_indices = @transform_0, window_bounds = array<i64: 8, 64>}, {pipeline_mode = #tpu.pipeline_mode<synchronous>, transform_indices = @transform_1, window_bounds = array<i64: 64, 256>}, {pipeline_mode = #tpu.pipeline_mode<synchronous>, transform_indices = @transform_2, window_bounds = array<i64: 1, 256>}, {pipeline_mode = #tpu.pipeline_mode<synchronous>, transform_indices = @transform_3, window_bounds = array<i64: 256, 256>}, {pipeline_mode = #tpu.pipeline_mode<synchronous>, transform_indices = @transform_4, window_bounds = array<i64: 1, 256>}, {pipeline_mode = #tpu.pipeline_mode<synchronous>, transform_indices = @transform_5, window_bounds = array<i64: 256, 192>}, {pipeline_mode = #tpu.pipeline_mode<synchronous>, transform_indices = @transform_6, window_bounds = array<i64: 1, 192>}, {transform_indices = @transform_7, window_bounds = array<i64: 8, 192>}]} {
    %c0 = arith.constant 0 : index
    %c0_0 = arith.constant 0 : index
    %0 = vector.load %arg1[%c0, %c0_0] : memref<8x64xf32, #tpu.memory_space<vmem>>, vector<8x64xf32>
    %1 = arith.truncf %0 : vector<8x64xf32> to vector<8x64xbf16>
    %c0_1 = arith.constant 0 : index
    %c0_2 = arith.constant 0 : index
    %2 = vector.load %arg2[%c0_1, %c0_2] : memref<64x256xbf16, #tpu.memory_space<vmem>>, vector<64x256xbf16>
    %cst = arith.constant dense<0.000000e+00> : vector<8x256xf32>
    %3 = tpu.matmul %1, %2, %cst {dimension_numbers = #tpu.dot_dimension_numbers<[1], [0], [0], [1], [0, 0, 1, 1], [], []>} : vector<8x64xbf16>, vector<64x256xbf16>, vector<8x256xf32> -> vector<8x256xf32>
    %c0_3 = arith.constant 0 : index
    %c0_4 = arith.constant 0 : index
    %4 = vector.load %arg3[%c0_3, %c0_4] : memref<1x256xf32, #tpu.memory_space<vmem>>, vector<1x256xf32>
    %5 = vector.broadcast %4 : vector<1x256xf32> to vector<8x256xf32>
    %6 = arith.addf %3, %5 : vector<8x256xf32>
    %cst_5 = arith.constant 0.000000e+00 : f32
    %7 = vector.broadcast %cst_5 : f32 to vector<8x256xf32>
    %8 = arith.maximumf %6, %7 : vector<8x256xf32>
    %9 = arith.truncf %8 : vector<8x256xf32> to vector<8x256xbf16>
    %c0_6 = arith.constant 0 : index
    %c0_7 = arith.constant 0 : index
    %10 = vector.load %arg4[%c0_6, %c0_7] : memref<256x256xbf16, #tpu.memory_space<vmem>>, vector<256x256xbf16>
    %cst_8 = arith.constant dense<0.000000e+00> : vector<8x256xf32>
    %11 = tpu.matmul %9, %10, %cst_8 {dimension_numbers = #tpu.dot_dimension_numbers<[1], [0], [0], [1], [0, 0, 1, 1], [], []>} : vector<8x256xbf16>, vector<256x256xbf16>, vector<8x256xf32> -> vector<8x256xf32>
    %c0_9 = arith.constant 0 : index
    %c0_10 = arith.constant 0 : index
    %12 = vector.load %arg5[%c0_9, %c0_10] : memref<1x256xf32, #tpu.memory_space<vmem>>, vector<1x256xf32>
    %13 = vector.broadcast %12 : vector<1x256xf32> to vector<8x256xf32>
    %14 = arith.addf %11, %13 : vector<8x256xf32>
    %cst_11 = arith.constant 0.000000e+00 : f32
    %15 = vector.broadcast %cst_11 : f32 to vector<8x256xf32>
    %16 = arith.maximumf %14, %15 : vector<8x256xf32>
    %17 = arith.truncf %16 : vector<8x256xf32> to vector<8x256xbf16>
    %c0_12 = arith.constant 0 : index
    %c0_13 = arith.constant 0 : index
    %18 = vector.load %arg6[%c0_12, %c0_13] : memref<256x192xbf16, #tpu.memory_space<vmem>>, vector<256x192xbf16>
    %cst_14 = arith.constant dense<0.000000e+00> : vector<8x192xf32>
    %19 = tpu.matmul %17, %18, %cst_14 {dimension_numbers = #tpu.dot_dimension_numbers<[1], [0], [0], [1], [0, 0, 1, 1], [], []>} : vector<8x256xbf16>, vector<256x192xbf16>, vector<8x192xf32> -> vector<8x192xf32>
    %c0_15 = arith.constant 0 : index
    %c0_16 = arith.constant 0 : index
    %20 = vector.load %arg7[%c0_15, %c0_16] : memref<1x192xf32, #tpu.memory_space<vmem>>, vector<1x192xf32>
    %21 = vector.broadcast %20 : vector<1x192xf32> to vector<8x192xf32>
    %22 = arith.addf %19, %21 : vector<8x192xf32>
    %c0_17 = arith.constant 0 : index
    %c0_18 = arith.constant 0 : index
    %23 = vector.load %arg8[%c0_17, %c0_18] : memref<8x192xf32, #tpu.memory_space<vmem>>, vector<8x192xf32>
    tpu.vector_store %arg8[%c0_17, %c0_18], %22 {strides = array<i32>} : memref<8x192xf32, #tpu.memory_space<vmem>>, vector<8x192xf32>,
    return
  }
  func.func @transform_0(%arg0: i32) -> (i32, i32) {
    %c0_i32 = arith.constant 0 : i32
    %c0_i32_0 = arith.constant 0 : i32
    return %arg0, %c0_i32 : i32, i32
  }
  func.func @transform_1(%arg0: i32) -> (i32, i32) {
    %c0_i32 = arith.constant 0 : i32
    %c0_i32_0 = arith.constant 0 : i32
    %c0_i32_1 = arith.constant 0 : i32
    return %c0_i32, %c0_i32_0 : i32, i32
  }
  func.func @transform_2(%arg0: i32) -> (i32, i32) {
    %c0_i32 = arith.constant 0 : i32
    %c0_i32_0 = arith.constant 0 : i32
    %c0_i32_1 = arith.constant 0 : i32
    return %c0_i32, %c0_i32_0 : i32, i32
  }
  func.func @transform_3(%arg0: i32) -> (i32, i32) {
    %c0_i32 = arith.constant 0 : i32
    %c0_i32_0 = arith.constant 0 : i32
    %c0_i32_1 = arith.constant 0 : i32
    return %c0_i32, %c0_i32_0 : i32, i32
  }
  func.func @transform_4(%arg0: i32) -> (i32, i32) {
    %c0_i32 = arith.constant 0 : i32
    %c0_i32_0 = arith.constant 0 : i32
    %c0_i32_1 = arith.constant 0 : i32
    return %c0_i32, %c0_i32_0 : i32, i32
  }
  func.func @transform_5(%arg0: i32) -> (i32, i32) {
    %c0_i32 = arith.constant 0 : i32
    %c0_i32_0 = arith.constant 0 : i32
    %c0_i32_1 = arith.constant 0 : i32
    return %c0_i32, %c0_i32_0 : i32, i32
  }
  func.func @transform_6(%arg0: i32) -> (i32, i32) {
    %c0_i32 = arith.constant 0 : i32
    %c0_i32_0 = arith.constant 0 : i32
    %c0_i32_1 = arith.constant 0 : i32
    return %c0_i32, %c0_i32_0 : i32, i32
  }
  func.func @transform_7(%arg0: i32) -> (i32, i32) {
    %c0_i32 = arith.constant 0 : i32
    %c0_i32_0 = arith.constant 0 : i32
    return %arg0, %c0_i32 : i32, i32
  }
}

</mosaic_0001>

<bundles_post_ra>
// kernel: tpu_custom_call.1
= control target key start
LH: loop header
LB: loop body
LE: loop exit
PB: predicated region body
PF: predicated region fallthrough
CT: control target
= control target key end

     0   :  { %v854_v2 = vmov 0   ;;  %vm90_vm0 = vcmask 523264   ;;  %s1129_s0 = inlined_call_operand.vmem [shape: f32[8,64], index: 0, kind: input, shape index: {}]   ;;  %s1130_s1 = inlined_call_operand.vmem [shape: bf16[64,256], index: 1, kind: input, shape index: {}]   ;;  %s1131_s2 = inlined_call_operand.vmem [shape: f32[1,256], index: 2, kind: input, shape index: {}]   ;;  %s1132_s3 = inlined_call_operand.vmem [shape: bf16[256,256], index: 3, kind: input, shape index: {}]   ;;  %s1133_s4 = inlined_call_operand.vmem [shape: f32[1,256], index: 4, kind: input, shape index: {}]   ;;  %s1134_s5 = inlined_call_operand.vmem [shape: bf16[256,192], index: 5, kind: input, shape index: {}]   ;;  %s1135_s6 = inlined_call_operand.vmem [shape: f32[1,192], index: 6, kind: input, shape index: {}]   ;;  %s1136_s7 = inlined_call_operand.hbm [shape: f32[8,192], index: 7, kind: output, shape index: {}]  }
   0x1   :  { %v724_v0 = vld [vmem:[%s1130_s1 + $0x34] ss:$8 sps:$4 sm:$0xff]   ;;  %v726_v1 = vld [vmem:[%s1130_s1 + $0x30] ss:$8 sps:$4 sm:$0xff]   ;;  %126 = vmatprep.mubr.bf16.mxu0 %v854_v2  ;;  %v727_v3 = vld [vmem:[%s1130_s1 + $0x24] ss:$8 sps:$4 sm:$0xff]  }
   0x2   :  { %102 = vmatprep.subr.bf16.mxu0 %v724_v0  ;;  %v729_v4 = vld [vmem:[%s1130_s1 + $0x20] ss:$8 sps:$4 sm:$0xff]   ;;  %v730_v5 = vld [vmem:[%s1130_s1 + $0x14] ss:$8 sps:$4 sm:$0xff]   ;;  %v732_v6 = vld [vmem:[%s1130_s1 + $0x10] ss:$8 sps:$4 sm:$0xff]  }
   0x3   :  { %103 = vmatpush1.bf16.msra.mxu0 %v726_v1  ;;  %v736_v7 = vld [vmem:[%s1132_s3 + $0x74] ss:$8 sps:$4 sm:$0xff]   ;;  %v738_v8 = vld [vmem:[%s1132_s3 + $0x70] ss:$8 sps:$4 sm:$0xff]   ;;  %v739_v9 = vld [vmem:[%s1132_s3 + $0x64] ss:$8 sps:$4 sm:$0xff]  }
   0x4   :  { %104 = vmatprep.subr.bf16.mxu0 %v727_v3  ;;  %v733_v10 = vld [vmem:[%s1130_s1 + $0x4] ss:$8 sps:$4 sm:$0xff]   ;;  %343 = vmatprep.subr.bf16.mxu1 %v736_v7  ;;  %v741_v11 = vld [vmem:[%s1132_s3 + $0x60] ss:$8 sps:$4 sm:$0xff]   ;;  %v742_v13 = vld [vmem:[%s1132_s3 + $0x54] ss:$8 sps:$4 sm:$0xff]  }
   0x5   :  { %344 = vmatpush1.bf16.msra.mxu1 %v738_v8  ;;  %v735_v12 = vld [vmem:[%s1130_s1] ss:$8 sps:$4 sm:$0xff]   ;;  %v744_v15 = vld [vmem:[%s1132_s3 + $0x50] ss:$8 sps:$4 sm:$0xff]   ;;  %v745_v17 = vld [vmem:[%s1132_s3 + $0x44] ss:$8 sps:$4 sm:$0xff]  }
   0x6   :  { %345 = vmatprep.subr.bf16.mxu1 %v739_v9  ;;  %v28_v14 = vld [vmem:[%s1129_s0] sm:$0xff]  ;;  %v748_v19 = vld [vmem:[%s1132_s3 + $0x34] ss:$8 sps:$4 sm:$0xff]   ;;  %v750_v20 = vld [vmem:[%s1132_s3 + $0x30] ss:$8 sps:$4 sm:$0xff]  }
   0x7   :  { %105 = vmatpush1.bf16.msra.mxu0 %v729_v4  ;;  %v29_v16 = vpack.c.bf16 %v28_v14, %v28_v14  ;;  %v747_v18 = vld [vmem:[%s1132_s3 + $0x40] ss:$8 sps:$4 sm:$0xff]   ;;  %v751_v21 = vld [vmem:[%s1132_s3 + $0x24] ss:$8 sps:$4 sm:$0xff]   ;;  %v754_v23 = vld [vmem:[%s1132_s3 + $0x14] ss:$8 sps:$4 sm:$0xff]  }
   0x8   :  { %106 = vmatprep.subr.bf16.mxu0 %v730_v5  ;;  %v753_v22 = vld [vmem:[%s1132_s3 + $0x20] ss:$8 sps:$4 sm:$0xff]   ;;  %v756_v24 = vld [vmem:[%s1132_s3 + $0x10] ss:$8 sps:$4 sm:$0xff]   ;;  %v757_v25 = vld [vmem:[%s1132_s3 + $0x4] ss:$8 sps:$4 sm:$0xff]  }
   0x9   :  { %346 = vmatpush1.bf16.msra.mxu1 %v741_v11  ;;  %v759_v26 = vld [vmem:[%s1132_s3] ss:$8 sps:$4 sm:$0xff]   ;;  %v760_v27 = vld [vmem:[%s1132_s3 + $0xf4] ss:$8 sps:$4 sm:$0xff]  }
   0xa   :  { %347 = vmatprep.subr.bf16.mxu1 %v742_v13 }
   0xb   :  { %107 = vmatpush1.bf16.msra.mxu0 %v732_v6 }
   0xc   :  { %108 = vmatprep.subr.bf16.mxu0 %v733_v10 }
   0xd   :  { %348 = vmatpush1.bf16.msra.mxu1 %v744_v15 }
   0xe   :  { %349 = vmatprep.subr.bf16.mxu1 %v745_v17 }
   0xf   :  { %109 = vmatpush1.bf16.msra.mxu0 %v735_v12 }
  0x11   :  { %350 = vmatpush1.bf16.msra.mxu1 %v747_v18 }
  0x12   :  { %657 = vmatmul.mubr.msk.bf16.vlgmr.msra.gmra.mxu0 %vm90_vm0, %v29_v16  ;;  %351 = vmatprep.subr.bf16.mxu1 %v748_v19 }
  0x15   :  { %352 = vmatpush1.bf16.msra.mxu1 %v750_v20 }
  0x16   :  { %353 = vmatprep.subr.bf16.mxu1 %v751_v21 }
  0x19   :  { %354 = vmatpush1.bf16.msra.mxu1 %v753_v22 }
  0x1a   :  { %355 = vmatprep.subr.bf16.mxu1 %v754_v23 }
  0x1d   :  { %356 = vmatpush1.bf16.msra.mxu1 %v756_v24 }
  0x1e   :  { %357 = vmatprep.subr.bf16.mxu1 %v757_v25 }
  0x1f   :  { %12 = vsyncpa [#allocation3], 0  ;;  %v762_v28 = vld [vmem:[%s1132_s3 + $0xf0] ss:$8 sps:$4 sm:$0xff]   ;;  %v763_v29 = vld [vmem:[%s1132_s3 + $0xe4] ss:$8 sps:$4 sm:$0xff]   ;;  %v40_v7 = vlaneseq }
  0x20   :  { %v765_v30 = vld [vmem:[%s1132_s3 + $0xe0] ss:$8 sps:$4 sm:$0xff]   ;;  %v766_v31 = vld [vmem:[%s1132_s3 + $0xd4] ss:$8 sps:$4 sm:$0xff]   ;;  %v768_v32 = vld [vmem:[%s1132_s3 + $0xd0] ss:$8 sps:$4 sm:$0xff]  }
  0x21   :  { %358 = vmatpush1.bf16.msra.mxu1 %v759_v26  ;;  %v769_v33 = vld [vmem:[%s1132_s3 + $0xc4] ss:$8 sps:$4 sm:$0xff]   ;;  %v771_v34 = vld [vmem:[%s1132_s3 + $0xc0] ss:$8 sps:$4 sm:$0xff]   ;;  %v772_v35 = vld [vmem:[%s1132_s3 + $0xb4] ss:$8 sps:$4 sm:$0xff]  }
  0x22   :  { %359 = vmatprep.subr.bf16.mxu1 %v760_v27  ;;  %v774_v36 = vld [vmem:[%s1132_s3 + $0xb0] ss:$8 sps:$4 sm:$0xff]   ;;  %v775_v37 = vld [vmem:[%s1132_s3 + $0xa4] ss:$8 sps:$4 sm:$0xff]   ;;  %v777_v38 = vld [vmem:[%s1132_s3 + $0xa0] ss:$8 sps:$4 sm:$0xff]  }
  0x23   :  { %v778_v39 = vld [vmem:[%s1132_s3 + $0x94] ss:$8 sps:$4 sm:$0xff]   ;;  %v780_v40 = vld [vmem:[%s1132_s3 + $0x90] ss:$8 sps:$4 sm:$0xff]   ;;  %v781_v41 = vld [vmem:[%s1132_s3 + $0x84] ss:$8 sps:$4 sm:$0xff]  }
  0x24   :  { %v783_v42 = vld [vmem:[%s1132_s3 + $0x80] ss:$8 sps:$4 sm:$0xff]   ;;  %v784_v43 = vld [vmem:[%s1134_s5 + $0x70] ss:$8 sps:$4 sm:$0xff]   ;;  %v786_v44 = vld [vmem:[%s1134_s5 + $0x74] ss:$8 sps:$4 sm:$0xff]  }
  0x25   :  { %360 = vmatpush2.bf16.msra.mxu1 %v762_v28  ;;  %v789_v45 = vld [vmem:[%s1134_s5 + $0x64] ss:$8 sps:$4 sm:$0xff]   ;;  %592 = vmatprep.subr.bf16.mxu0 %v786_v44  ;;  %v787_v46 = vld [vmem:[%s1134_s5 + $0x60] ss:$8 sps:$4 sm:$0xff]   ;;  %v792_v47 = vld [vmem:[%s1134_s5 + $0x54] ss:$8 sps:$4 sm:$0xff]  }
  0x26   :  { %361 = vmatprep.subr.bf16.mxu1 %v763_v29  ;;  %593 = vmatpush1.bf16.msra.mxu0 %v784_v43  ;;  %v790_v48 = vld [vmem:[%s1134_s5 + $0x50] ss:$8 sps:$4 sm:$0xff]   ;;  %v795_v49 = vld [vmem:[%s1134_s5 + $0x44] ss:$8 sps:$4 sm:$0xff]   ;;  %v793_v50 = vld [vmem:[%s1134_s5 + $0x40] ss:$8 sps:$4 sm:$0xff]  }
  0x27   :  { %594 = vmatprep.subr.bf16.mxu0 %v789_v45  ;;  %v798_v51 = vld [vmem:[%s1134_s5 + $0x34] ss:$8 sps:$4 sm:$0xff]   ;;  %v796_v52 = vld [vmem:[%s1134_s5 + $0x30] ss:$8 sps:$4 sm:$0xff]   ;;  %v801_v53 = vld [vmem:[%s1134_s5 + $0x24] ss:$8 sps:$4 sm:$0xff]  }
  0x28   :  { %v799_v54 = vld [vmem:[%s1134_s5 + $0x20] ss:$8 sps:$4 sm:$0xff]   ;;  %v804_v55 = vld [vmem:[%s1134_s5 + $0x14] ss:$8 sps:$4 sm:$0xff]   ;;  %v802_v56 = vld [vmem:[%s1134_s5 + $0x10] ss:$8 sps:$4 sm:$0xff]  }
  0x29   :  { %362 = vmatpush2.bf16.msra.mxu1 %v765_v30  ;;  %v807_v57 = vld [vmem:[%s1134_s5 + $0x4] ss:$8 sps:$4 sm:$0xff]   ;;  %v805_v58 = vld [vmem:[%s1134_s5] ss:$8 sps:$4 sm:$0xff]   ;;  %v810_v59 = vld [vmem:[%s1134_s5 + $0xf4] ss:$8 sps:$4 sm:$0xff]  }
  0x2a   :  { %363 = vmatprep.subr.bf16.mxu1 %v766_v31  ;;  %595 = vmatpush1.bf16.msra.mxu0 %v787_v46  ;;  %v808_v60 = vld [vmem:[%s1134_s5 + $0xf0] ss:$8 sps:$4 sm:$0xff]   ;;  %v813_v61 = vld [vmem:[%s1134_s5 + $0xe4] ss:$8 sps:$4 sm:$0xff]   ;;  %v811_v62 = vld [vmem:[%s1134_s5 + $0xe0] ss:$8 sps:$4 sm:$0xff]  }
  0x2b   :  { %596 = vmatprep.subr.bf16.mxu0 %v792_v47  ;;  %v816_v63 = vld [vmem:[%s1134_s5 + $0xd4] ss:$8 sps:$4 sm:$0xff]   ;;  %v814_v0 = vld [vmem:[%s1134_s5 + $0xd0] ss:$8 sps:$4 sm:$0xff]   ;;  %v819_v1 = vld [vmem:[%s1134_s5 + $0xc4] ss:$8 sps:$4 sm:$0xff]  }
  0x2c   :  { %v817_v2 = vld [vmem:[%s1134_s5 + $0xc0] ss:$8 sps:$4 sm:$0xff]   ;;  %v822_v3 = vld [vmem:[%s1134_s5 + $0xb4] ss:$8 sps:$4 sm:$0xff]   ;;  %v820_v4 = vld [vmem:[%s1134_s5 + $0xb0] ss:$8 sps:$4 sm:$0xff]  }
  0x2d   :  { %364 = vmatpush2.bf16.msra.mxu1 %v768_v32  ;;  %v825_v5 = vld [vmem:[%s1134_s5 + $0xa4] ss:$8 sps:$4 sm:$0xff]   ;;  %v823_v6 = vld [vmem:[%s1134_s5 + $0xa0] ss:$8 sps:$4 sm:$0xff]   ;;  %v41_v8 = vshrl.u32 %v40_v7, 7 }
  0x2e   :  { %365 = vmatprep.subr.bf16.mxu1 %v769_v33  ;;  %597 = vmatpush1.bf16.msra.mxu0 %v790_v48  ;;  %v38_v10 = vld [vmem:[%s1131_s2] sm:$0x3]  ;;  %v828_v24 = vld [vmem:[%s1134_s5 + $0x94] ss:$8 sps:$4 sm:$0xff]   ;;  %v826_v25 = vld [vmem:[%s1134_s5 + $0x90] ss:$8 sps:$4 sm:$0xff]  }
  0x2f   :  { %598 = vmatprep.subr.bf16.mxu0 %v795_v49  ;;  %v42_v9 = vsub.s32 0, %v41_v8  ;;  %v46_v11 = vsub.s32 1, %v41_v8  ;;  %v831_v26 = vld [vmem:[%s1134_s5 + $0x84] ss:$8 sps:$4 sm:$0xff]   ;;  %v829_v27 = vld [vmem:[%s1134_s5 + $0x80] ss:$8 sps:$4 sm:$0xff]  }
  0x30   :  { %v171_v28 = vld [vmem:[%s1133_s4] sm:$0x3]  ;;  %s855_s4 = smov [#allocation2]  }
  0x31   :  { %366 = vmatpush2.bf16.msra.mxu1 %v771_v34  ;;  %v43_v12 = vrot.slane %v38_v10, %v42_v9  ;;  %v47_v13 = vrot.slane %v38_v10, %v46_v11  ;;  %v176_v29 = vrot.slane %v171_v28, %v42_v9  ;;  %v180_v30 = vrot.slane %v171_v28, %v46_v11  ;;  %s641_s23 = sshll.u32 %s855_s4, 4  ;;  %s642_s23 = int_to_ptr.vmem [resolvable:$true] %s641_s23 }
  0x32   :  { %367 = vmatprep.subr.bf16.mxu1 %v772_v35  ;;  %599 = vmatpush1.bf16.msra.mxu0 %v793_v50  ;;  %s832_s24 = scalar_lea.vmem %s642_s23, 256  ;;  %p837_p1 = scmp.lt.s32.totalorder %s642_s23, %s642_s23 }
  0x33   :  { %600 = vmatprep.subr.bf16.mxu0 %v798_v51  ;;  %p833_p0 = scmp.ne.s32.totalorder %s642_s23, %s832_s24  ;;  %p838_p2 = scmp.lt.s32.totalorder %s832_s24, %s832_s24 }
  0x35   :  { %368 = vmatpush2.bf16.msra.mxu1 %v774_v36  ;;  %p839_p3 = por %p838_p2, %p837_p1 }
  0x36   :  { %369 = vmatprep.subr.bf16.mxu1 %v775_v37  ;;  %601 = vmatpush1.bf16.msra.mxu0 %v796_v52 }
  0x37   :  { %602 = vmatprep.subr.bf16.mxu0 %v801_v53  ;;  %p840_p4 = pnand %p839_p3, %p833_p0 }
  0x39   :  { %370 = vmatpush2.bf16.msra.mxu1 %v777_v38 }
  0x3a   :  { %371 = vmatprep.subr.bf16.mxu1 %v778_v39  ;;  %603 = vmatpush1.bf16.msra.mxu0 %v799_v54 }
  0x3b   :  { %604 = vmatprep.subr.bf16.mxu0 %v804_v55 }
  0x3d   :  { %372 = vmatpush2.bf16.msra.mxu1 %v780_v40 }
  0x3e   :  { %373 = vmatprep.subr.bf16.mxu1 %v781_v41  ;;  %605 = vmatpush1.bf16.msra.mxu0 %v802_v56  ;;  %v420_v41 = vld [vmem:[%s1135_s6] sm:$0x3] }
  0x3f   :  { %606 = vmatprep.subr.bf16.mxu0 %v807_v57  ;;  %v429_v43 = vrot.slane %v420_v41, %v46_v11 }
  0x41   :  { %374 = vmatpush2.bf16.msra.mxu1 %v783_v42  ;;  %v425_v42 = vrot.slane %v420_v41, %v42_v9 }
  0x42   :  { %607 = vmatpush1.bf16.msra.mxu0 %v805_v58 }
  0x43   :  { %608 = vmatprep.subr.bf16.mxu0 %v810_v59 }
  0x46   :  { %609 = vmatpush2.bf16.msra.mxu0 %v808_v60 }
  0x47   :  { %610 = vmatprep.subr.bf16.mxu0 %v813_v61 }
  0x4a   :  { %611 = vmatpush2.bf16.msra.mxu0 %v811_v62 }
  0x4b   :  { %612 = vmatprep.subr.bf16.mxu0 %v816_v63 }
  0x4e   :  { %613 = vmatpush2.bf16.msra.mxu0 %v814_v0 }
  0x4f   :  { %614 = vmatprep.subr.bf16.mxu0 %v819_v1 }
  0x52   :  { %615 = vmatpush2.bf16.msra.mxu0 %v817_v2 }
  0x53   :  { %616 = vmatprep.subr.bf16.mxu0 %v822_v3 }
  0x56   :  { %617 = vmatpush2.bf16.msra.mxu0 %v820_v4 }
  0x57   :  { %618 = vmatprep.subr.bf16.mxu0 %v825_v5 }
  0x5a   :  { %619 = vmatpush2.bf16.msra.mxu0 %v823_v6 }
  0x5b   :  { %620 = vmatprep.subr.bf16.mxu0 %v828_v24 }
  0x5e   :  { %621 = vmatpush2.bf16.msra.mxu0 %v826_v25 }
  0x5f   :  { %622 = vmatprep.subr.bf16.mxu0 %v831_v26 }
  0x62   :  { %623 = vmatpush2.bf16.msra.mxu0 %v829_v27 }
  0xd2   :  { %v128_v14 = vpop.f32.mrf.mxu0 }
  0xd3   :  { %v129_v15 = vadd.f32 %v128_v14, %v43_v12 }
  0xd4   :  { %v130_v16 = vpop.f32.mrf.mxu0 }
  0xd5   :  { %v131_v17 = vadd.f32 %v130_v16, %v47_v13  ;;  %v135_v18 = vmax.f32 %v129_v15, 0.0 }
  0xd6   :  { %v132_v19 = vpop.f32.mrf.mxu0 }
  0xd7   :  { %v136_v20 = vmax.f32 %v131_v17, 0.0  ;;  %v137_v23 = vpack.c.bf16 %v135_v18, %v135_v18 }
  0xd8   :  { %v133_v21 = vpop.f32.mrf.mxu0 }
  0xd9   :  { %v138_v22 = vpack.c.bf16 %v136_v20, %v136_v20 }
  0xdb   :  { %375 = vmatprep.mubr.bf16.mxu1 %v138_v22 }
  0xdc   :  { %376 = vmatmul.mubr.bf16.vlgmr.msra.gmra.mxu1 %v137_v23 }
 0x19c   :  { %v377_v31 = vpop.f32.mrf.mxu1 }
 0x19d   :  { %v378_v32 = vadd.f32 %v377_v31, %v176_v29 }
 0x19e   :  { %v379_v33 = vpop.f32.mrf.mxu1 }
 0x19f   :  { %v380_v34 = vadd.f32 %v379_v33, %v180_v30  ;;  %v384_v35 = vmax.f32 %v378_v32, 0.0 }
 0x1a0   :  { %v381_v36 = vpop.f32.mrf.mxu1 }
 0x1a1   :  { %v385_v37 = vmax.f32 %v380_v34, 0.0  ;;  %v386_v40 = vpack.c.bf16 %v384_v35, %v384_v35 }
 0x1a2   :  { %v382_v38 = vpop.f32.mrf.mxu1 }
 0x1a3   :  { %v387_v39 = vpack.c.bf16 %v385_v37, %v385_v37 }
 0x1a5   :  { %624 = vmatprep.mubr.bf16.mxu0 %v387_v39 }
 0x1a6   :  { %625 = vmatmul.mubr.bf16.vlgmr.msra.gmra.mxu0 %v386_v40 }
 0x266   :  { %v626_v44 = vpop.f32.mrf.mxu0 }
 0x267   :  { %v627_v45 = vadd.f32 %v626_v44, %v425_v42 }
 0x268   :  { %v628_v46 = vpop.f32.mrf.mxu0 }
 0x269   :  { %633 = vst [vmem:[#allocation2] sm:$0xff] %v627_v45  ;;  %v629_v47 = vadd.f32 %v628_v46, %v429_v43 }
 0x26a   :  { %v630_v48 = vpop.f32.mrf.mxu0 }
 0x26b   :  { %634 = vst.msk [vmem:[#allocation2 + $0x8] sm:$0xff] %vm90_vm0, %v629_v47 }
 0x26c   :  { %v631_v49 = vpop.f32.mrf.mxu0 }
 0x26d   :  { %843 = shalt.err (!%p840_p4)
}
 0x26e   :  { %644 = dma.vmem_to_hbm [thread:$0]  %s642_s23, 256, %s1136_s7, [#allocation3]  }
 0x26f   :  { %852 = dma.done.wait [#allocation3], 256  }
 0x270   :  { %853 = vsyncadd [#allocation3], 4294967040 }
 0x271   :  { %648 = vsyncpa [#allocation3], 1 }

</bundles_post_ra>
